<compile_context>
chip_gen: v7x
topology: tpu7x:2x2x1
jax: 0.10.0
libtpu: 0.0.40
codegen_flags: <defaults>
</compile_context>

<pallas_src>
import jax
import jax.numpy as jnp
from jax.experimental import pallas as pl
from jax.experimental.pallas import tpu as pltpu


def _sse_kernel(w_ref, x_ref, o_ref):
    # w_ref: (1, C, 1)  f32 conv weight (same block every grid step)
    # x_ref: (bN, C, TS) input tile (original dtype), channels on sublanes
    # o_ref: (bN, C, TS) output tile
    x = x_ref[...]                                          # (bN, C, TS)
    w = w_ref[...]                                          # (1,  C, 1) f32
    # 1x1x1 conv to one channel == weighted sum over the channel (sublane)
    # axis, accumulated in f32 (VPU multiply + XLU sublane reduce).
    q = jnp.sum(x.astype(jnp.float32) * w, axis=1, keepdims=True)  # (bN,1,TS)
    q = jax.nn.sigmoid(q)                                   # EUP
    # Multiply on the original-dtype tile (no full-tile f32 temp kept live).
    o_ref[...] = x * q.astype(x.dtype)                      # broadcast over C


def _vmem_budget():
    """Per-generation VMEM budget for the double-buffered tiles + limit."""
    try:
        cap = int(pltpu.get_tpu_info().vmem_capacity_bytes)
    except Exception:
        cap = 64 << 20                        # conservative (v7x-sized) default
    if cap >= (128 << 20):                    # v5e / v6e: 128 MiB physical
        budget = 88 << 20
    else:                                     # v7x: 64 MiB per TensorCore
        budget = max(16 << 20, min(40 << 20, cap - (24 << 20)))
    limit = max(budget, min(cap - (4 << 20), budget + (12 << 20)))
    return budget, limit


def _largest_divisor_le(n, cap):
    cap = max(1, min(n, cap))
    return max(d for d in range(1, cap + 1) if n % d == 0)


def _choose_blocks(N, C, S, dtype, vmem_budget, target_bytes=4 << 20):
    """Pick (batch sub-block, lane tile): lane tile is a multiple of 128,
    sized for ~target_bytes per input buffer and the given VMEM budget,
    accounting for sublane padding of C."""
    itemsize = jnp.dtype(dtype).itemsize
    granule = 8 * max(1, 4 // itemsize)       # sublane granule: 8/16/32
    c_pad = pl.cdiv(C, granule) * granule     # padded channels, input dtype
    c_pad32 = pl.cdiv(C, 8) * 8               # padded channels, f32 temps

    # Per (batch-element, lane) column resident in VMEM:
    #   2x double-buffered input + 2x double-buffered output + one f32 temp.
    bytes_per_lane = 4 * c_pad * itemsize + 4 * c_pad32
    s_ceil = pl.cdiv(S, 128) * 128

    # Lane tile (assuming bN = 1 first).
    tile_cap = max(128, (vmem_budget // bytes_per_lane) // 128 * 128)
    tile_tgt = max(128, (target_bytes // (c_pad * itemsize)) // 128 * 128)
    tile_s = min(tile_cap, tile_tgt, s_ceil)

    # Batch sub-block: pack batch elements when the spatial slab is small.
    bn_cap = max(1, vmem_budget // (bytes_per_lane * tile_s))
    bn_tgt = max(1, target_bytes // (c_pad * itemsize * tile_s))
    bn = _largest_divisor_le(N, min(bn_cap, bn_tgt))

    # Keep >= 2 grid steps so both TensorCores (v7x megacore) get work.
    if pl.cdiv(N, bn) * pl.cdiv(S, tile_s) < 2:
        if s_ceil > 128:
            tile_s = max(128, pl.cdiv(pl.cdiv(S, 128), 2) * 128)
        elif N > 1:
            bn = _largest_divisor_le(N, pl.cdiv(N, 2))
    return bn, tile_s


def sse_forward(U, w, *, block_n=None, tile_s=None):
    """U: (N, C, D, H, W), w: (C,) conv weight (out_channels=1, no bias)."""
    N, C, D, H, W = U.shape
    S = D * H * W

    budget, vmem_limit = _vmem_budget()
    bn_auto, ts_auto = _choose_blocks(N, C, S, U.dtype, budget)
    bn = bn_auto if block_n is None else block_n
    ts = ts_auto if tile_s is None else tile_s

    # NCDHW -> (N, C, S): contiguous reshape.  No pad, no slice, no transpose.
    x = U.reshape(N, C, S)
    w3 = w.reshape(1, C, 1).astype(jnp.float32)

    grid = (pl.cdiv(N, bn), pl.cdiv(S, ts))
    out = pl.pallas_call(
        _sse_kernel,
        out_shape=jax.ShapeDtypeStruct((N, C, S), U.dtype),
        grid_spec=pltpu.PrefetchScalarGridSpec(
            num_scalar_prefetch=0,
            grid=grid,
            in_specs=[
                # weight: full (1, C, 1) block at every grid step
                pl.BlockSpec((1, C, 1), lambda n, i: (0, 0, 0)),
                # input tile: (bN, C, tile_s) lane-dense slab; partial last
                # block along S (and N, if any) handled by Pallas masking.
                pl.BlockSpec((bn, C, ts), lambda n, i: (n, 0, i)),
            ],
            out_specs=pl.BlockSpec((bn, C, ts), lambda n, i: (n, 0, i)),
        ),
        compiler_params=pltpu.CompilerParams(
            dimension_semantics=("parallel", "parallel"),
            vmem_limit_bytes=vmem_limit,
        ),
    )(w3, x)
    return out.reshape(N, C, D, H, W)


def sse_reference(U, w):
    # Elementwise-sum reference (avoids MXU precision differences vs kernel).
    q = jnp.sum(U.astype(jnp.float32) * w.reshape(1, -1, 1, 1, 1),
                axis=1, keepdims=True)
    q = jax.nn.sigmoid(q)
    return U * q.astype(U.dtype)


if __name__ == "__main__":
    key = jax.random.PRNGKey(0)
    k_u, k_w, k_u2, k_u3 = jax.random.split(key, 4)

    C = 4
    bound = 1.0 / (C ** 0.5)  # PyTorch default conv init bound
    w = jax.random.uniform(k_w, (C,), dtype=jnp.float32, minval=-bound, maxval=bound)

    # Case 1: "nice" shape (S = 256) -> spatial tiling, grid >= 2
    U = jax.random.normal(k_u, (2, C, 4, 8, 8), dtype=jnp.float32)
    out = jax.block_until_ready(sse_forward(U, w))
    ref = sse_reference(U, w)
    assert out.shape == U.shape
    assert jnp.allclose(out, ref, atol=1e-5, rtol=1e-5), "mismatch (case 1)"

    # Case 2: awkward spatial size (S = 105) -> partial last block, masked writeback
    U2 = jax.random.normal(k_u2, (1, C, 3, 7, 5), dtype=jnp.float32)
    out2 = jax.block_until_ready(sse_forward(U2, w))
    ref2 = sse_reference(U2, w)
    assert out2.shape == U2.shape
    assert jnp.allclose(out2, ref2, atol=1e-5, rtol=1e-5), "mismatch (case 2)"

    # Case 3: large batch, tiny spatial (S = 32) -> batch sub-block path
    U3 = jax.random.normal(k_u3, (8, C, 2, 4, 4), dtype=jnp.float32)
    out3 = jax.block_until_ready(sse_forward(U3, w))
    ref3 = sse_reference(U3, w)
    assert out3.shape == U3.shape
    assert jnp.allclose(out3, ref3, atol=1e-5, rtol=1e-5), "mismatch (case 3)"

    print("KERNEL_OK")
</pallas_src>

<mosaic_0001>
module attributes {stable_mosaic.version = 11 : i64} {
  func.func @_sse_kernel(%arg0: i32, %arg1: i32, %arg2: memref<1x4x1xf32, #tpu.memory_space<vmem>>, %arg3: memref<2x4x128xf32, #tpu.memory_space<vmem>>, %arg4: memref<2x4x128xf32, #tpu.memory_space<vmem>>) attributes {dimension_semantics = [#tpu.dimension_semantics<parallel>, #tpu.dimension_semantics<parallel>], iteration_bounds = array<i64: 1, 2>, scalar_prefetch = 0 : i64, scratch_operands = 0 : i64, tpu.core_type = #tpu.core_type<tc>, window_params = [{pipeline_mode = #tpu.pipeline_mode<synchronous>, transform_indices = @transform_0, window_bounds = array<i64: 1, 4, 1>}, {transform_indices = @transform_1, window_bounds = array<i64: 2, 4, 128>}, {transform_indices = @transform_2, window_bounds = array<i64: 2, 4, 128>}]} {
    %c0 = arith.constant 0 : index
    %c0_0 = arith.constant 0 : index
    %c0_1 = arith.constant 0 : index
    %0 = vector.load %arg3[%c0, %c0_0, %c0_1] : memref<2x4x128xf32, #tpu.memory_space<vmem>>, vector<2x4x128xf32>
    %c0_2 = arith.constant 0 : index
    %c0_3 = arith.constant 0 : index
    %c0_4 = arith.constant 0 : index
    %1 = vector.load %arg2[%c0_2, %c0_3, %c0_4] : memref<1x4x1xf32, #tpu.memory_space<vmem>>, vector<1x4x1xf32>
    %2 = vector.broadcast %1 : vector<1x4x1xf32> to vector<2x4x128xf32>
    %3 = arith.mulf %0, %2 : vector<2x4x128xf32>
    %cst = arith.constant dense<0.000000e+00> : vector<2x128xf32>
    %4 = vector.multi_reduction <add>, %3, %cst [1] : vector<2x4x128xf32> to vector<2x128xf32>
    %5 = vector.shape_cast %4 : vector<2x128xf32> to vector<2x1x128xf32>
    %6 = arith.negf %5 : vector<2x1x128xf32>
    %7 = math.exp %6 : vector<2x1x128xf32>
    %cst_5 = arith.constant 1.000000e+00 : f32
    %8 = vector.broadcast %cst_5 : f32 to vector<2x1x128xf32>
    %9 = arith.addf %8, %7 : vector<2x1x128xf32>
    %10 = arith.divf %8, %9 : vector<2x1x128xf32>
    %11 = vector.broadcast %10 : vector<2x1x128xf32> to vector<2x4x128xf32>
    %12 = arith.mulf %0, %11 : vector<2x4x128xf32>
    %c0_6 = arith.constant 0 : index
    %c0_7 = arith.constant 0 : index
    %c0_8 = arith.constant 0 : index
    %13 = vector.load %arg4[%c0_6, %c0_7, %c0_8] : memref<2x4x128xf32, #tpu.memory_space<vmem>>, vector<2x4x128xf32>
    tpu.vector_store %arg4[%c0_6, %c0_7, %c0_8], %12 {strides = array<i32>} : memref<2x4x128xf32, #tpu.memory_space<vmem>>, vector<2x4x128xf32>,
    return
  }
  func.func @transform_0(%arg0: i32, %arg1: i32) -> (i32, i32, i32) {
    %c0_i32 = arith.constant 0 : i32
    %c0_i32_0 = arith.constant 0 : i32
    %c0_i32_1 = arith.constant 0 : i32
    %c0_i32_2 = arith.constant 0 : i32
    return %c0_i32, %c0_i32_0, %c0_i32_1 : i32, i32, i32
  }
  func.func @transform_1(%arg0: i32, %arg1: i32) -> (i32, i32, i32) {
    %c0_i32 = arith.constant 0 : i32
    %c0_i32_0 = arith.constant 0 : i32
    return %arg0, %c0_i32, %arg1 : i32, i32, i32
  }
  func.func @transform_2(%arg0: i32, %arg1: i32) -> (i32, i32, i32) {
    %c0_i32 = arith.constant 0 : i32
    %c0_i32_0 = arith.constant 0 : i32
    return %arg0, %c0_i32, %arg1 : i32, i32, i32
  }
}

</mosaic_0001>

<bundles_post_ra>
// kernel: tpu_custom_call.1
= control target key start
LH: loop header
LB: loop body
LE: loop exit
PB: predicated region body
PF: predicated region fallthrough
CT: control target
= control target key end

     0   :  { %7 = vsyncpa [#allocation3], 0  ;;  %s735_s0 = inlined_call_operand.vmem [shape: f32[1,4,1], index: 0, kind: input, shape index: {}]   ;;  %s736_s1 = inlined_call_operand.hbm [shape: f32[2,4,256], index: 1, kind: input, shape index: {}]   ;;  %s737_s2 = inlined_call_operand.hbm [shape: f32[2,4,256], index: 2, kind: output, shape index: {}]  }
   0x1   :  { %9 = vsyncpa [#allocation3 + $0x1], 0 }
   0x2   :  { %10 = vsyncpa [#allocation4], 0 }
   0x3   :  { %12 = vsyncpa [#allocation4 + $0x1], 0  ;;  %s555_s9 = smov 0   ;;  %s557_s10 = smov 0  }
   0x4   :  { %s559_s11 = smov 0   ;;  %s561_s12 = smov 0  }
   0x5   :  { %s563_s13 = smov 0   ;;  %s565_s14 = smov 0  }
   0x6 LB: > { %s324_s15 = sadd.s32 4294967295, %s529_s14   ;;  %s325_s16 = sadd.s32 4294967294, %s529_s14   ;;  %s529_s14 = sphi %s565_s14, %s18_s14   ;;  %s525_s13 = sphi %s563_s13, %s751_s13   ;;  %s521_s12 = sphi %s561_s12, %s750_s12   ;;  %s517_s11 = sphi %s559_s11, %s749_s11   ;;  %s513_s10 = sphi %s557_s10, %s748_s10   ;;  %s509_s9 = sphi %s555_s9, %s747_s9  }
   0x7   : > { %s27_s17 = sadd.s32 1, %s525_s13  ;;  %s60_s18 = sadd.s32 1, %s517_s11 }
   0x8   : > { %p28_p0 = scmp.ge.s32.totalorder %s27_s17, 2  ;;  %p67_p1 = scmp.ne.s32.totalorder %s517_s11, %s513_s10 }
   0x9   : > { %p68_p2 = scmp.eq.s32.totalorder %s529_s14, 0  ;;  %p73_p3 = scmp.ne.s32.totalorder %s513_s10, %s509_s9 }
   0xa   : > { %s753_s17 = smov (%p28_p0, %s27_s17), 0  ;;  %p74_p5 = scmp.eq.s32.totalorder %s324_s15, 0 }
   0xb   : > { %p596_p4 = por %p68_p2, %p67_p1  ;;  %s56_s20 = ssub.s32 %s525_s13, %s753_s17 }
   0xc   : > { %p99_p6 = scmp.eq.s32.totalorder %s324_s15, 1  ;;  %p58_p7 = scmp.eq.s32.totalorder %s56_s20, 0 }
   0xd   : > { %p602_p8 = por %p74_p5, %p73_p3  ;;  %p105_p10 = scmp.eq.s32.totalorder %s325_s16, 1 }
   0xe   : > { %p606_p9 = por %p99_p6, %p67_p1  ;;  %p351_p13 = scmp.lt.s32.totalorder %s529_s14, 2 }
   0xf   : > { %s611_s23 = scalar_select %p58_p7, %s517_s11, %s60_s18  }
  0x10   : > { %s741_s22 = scalar_select %p606_p9, 1, 0 }
  0x11   : > { %p613_p11 = por %p105_p10, %p73_p3  ;;  %s128_s25 = sand.u32 1, %s517_s11  }
  0x12   : > { %s328_s26 = sshll.u32 %s128_s25, 3  ;;  %s329_s27 = sshll.u32 %s525_s13, 6 }
  0x13   : > { %s742_s24 = scalar_select %p613_p11, 1, 0 }
  0x14   : > { %s624_s30 = scalar_lea.hbm %s736_s1, %s329_s27  ;;  %s132_s3 = scalar_lea.vmem [#allocation2], %s328_s26 }
  0x15   : > { %s141_s4 = sshll.u32 %s132_s3, 4  ;;  %p630_p0 = pnand %p351_p13, %p596_p4  ;;  %s626_s4 = int_to_ptr.vmem [resolvable:$true] %s141_s4 }
  0x16   : > { %s634_s6 = scalar_lea.sflag [#allocation3], %s128_s25  ;;  %s417_s7 = scalar_lea.hbm %s624_s30, 128 }
  0x17   : > { %p418_p1 = scmp.ne.s32.totalorder %s624_s30, %s417_s7  ;;  %p419_p2 = pneg %p630_p0 }
  0x18   : > { %s422_s16 = scalar_lea.hbm %s736_s1, 256  ;;  %p423_p4 = scmp.lt.u32.totalorder %s624_s30, %s736_s1 }
  0x19   : > { %p420_p3 = pnand %p419_p2, %p418_p1  ;;  %p424_p6 = scmp.lt.u32.totalorder %s422_s16, %s417_s7 }
  0x1a   : > { %p426_p10 = scmp.lt.u32.totalorder %s417_s7, %s624_s30 }
  0x1b   : > { %p421_p5 = pneg %p420_p3  ;;  %p425_p7 = por %p424_p6, %p423_p4 }
  0x1d   : > { %p427_p13 = por %p426_p10, %p425_p7 }
  0x1f   : > { %p428_p12 = pnand %p427_p13, %p421_p5 }
  0x21   : > { %431 = shalt.err (!%p428_p12)
}
  0x22   : > { %s432_s20 = scalar_lea.vmem %s626_s4, 128  ;;  %s531_s25 = smov [#allocation2]  }
  0x23   : > { %p433_p1 = scmp.ne.s32.totalorder %s626_s4, %s432_s20  ;;  %s437_s26 = sshll.u32 %s531_s25, 4  ;;  %s438_s26 = int_to_ptr.vmem [resolvable:$false] %s437_s26 }
  0x24   : > { %s439_s27 = scalar_lea.vmem %s438_s26, 256  ;;  %p440_p9 = scmp.lt.s32.totalorder %s626_s4, %s438_s26 }
  0x25   : > { %p435_p3 = pnand %p433_p1, %p419_p2  ;;  %p441_p4 = scmp.lt.s32.totalorder %s439_s27, %s432_s20 }
  0x27   : > { %p436_p11 = pneg %p435_p3  ;;  %p442_p6 = por %p441_p4, %p440_p9 }
  0x29   : > { %p443_p7 = pnand %p442_p6, %p436_p11 }
  0x2b   : > { %446 = shalt.err (!%p443_p7)
}
  0x2c   : > { %s532_s28 = smov 128   ;;  %s533_s29 = smov 64  }
  0x2d   : > { %s534_s3 = smov 4   ;;  %p330_p12 = scmp.ge.s32.totalorder %s529_s14, 1 }
  0x2e   : > { %346 = dma.hbm_to_vmem [thread:$0]  (!%p630_p0), %s624_s30, 128, %s626_s4, %s634_s6, %s532_s28, %s533_s29, %s534_s3  }
  0x2f   : > { %p149_p2 = scmp.lt.s32.totalorder %s529_s14, 3 }
  0x31   : > { %p150_p5 = pnand %p330_p12, %p149_p2 }
  0x32   : > { %s665_s7 = sand.u32 (!%p150_p5), 1, %s513_s10  }
  0x33   : > { %153 = sbr.rel (%p150_p5) target bundleno = 249 (0xf9), region = 28  ;;  %s331_s8 = sshll.u32 (!%p150_p5), %s665_s7, 3 }
  0x34   : > { %s156_s15 = scalar_lea.sflag (!%p150_p5), [#allocation3], %s665_s7  ;;  %s159_s16 = scalar_lea.vmem (!%p150_p5), [#allocation2], %s331_s8 }
  0x3a   : > { %500 = dma.done.wait (%p602_p8), %s156_s15, 128  }
  0x3b   : > { %502 = vsyncadd (%p602_p8), %s156_s15, 4294967168  ;;  %v535_v0 = vmov 0   ;;  %v184_v1 = vld [vmem:[%s735_s0] sm:$0xf]  ;;  %v183_v3 = vld [vmem:[%s159_s16 + $0x4] sm:$0xf] }
  0x3c   : > { %408 = vset.pattern.permute.xlu0 %v535_v0  ;;  %v182_v2 = vld [vmem:[%s159_s16] sm:$0xf]  ;;  %vm192_vm0 = vcmask 1043456   ;;  %s179_s21 = scalar_lea.vmem [#allocation5], %s331_s8  ;;  %s336_s6 = sshll.u32 %s521_s12, 6 }
  0x3d   : > { %187 = vperm.xlu0 %408, %v184_v1   ;;  %s239_s5 = sshll.u32 %s179_s21, 4  ;;  %s686_s20 = scalar_lea.hbm %s737_s2, %s336_s6  ;;  %s681_s5 = int_to_ptr.vmem [resolvable:$true] %s239_s5 }
  0x3e   : > { %s224_s25 = scalar_lea.sflag [#allocation4], %s665_s7  ;;  %s447_s26 = scalar_lea.vmem %s681_s5, 128 }
  0x3f   : > { %p448_p8 = scmp.ne.s32.totalorder %s681_s5, %s447_s26  ;;  %p744_p9 = scmp.ne.s32.totalorder %s741_s22, 0 }
  0x40   : > { %s536_s12 = smov [#allocation5]  }
  0x41   : > { %p449_p11 = pnand %p448_p8, %p744_p9  ;;  %s451_s27 = sshll.u32 %s536_s12, 4  ;;  %s452_s27 = int_to_ptr.vmem [resolvable:$false] %s451_s27 }
  0x42   : > { %s453_s28 = scalar_lea.vmem %s452_s27, 256  ;;  %p454_p10 = scmp.lt.s32.totalorder %s681_s5, %s452_s27 }
  0x43   : > { %p450_p0 = pneg %p449_p11  ;;  %p455_p13 = scmp.lt.s32.totalorder %s453_s28, %s447_s26 }
  0x45   : > { %p456_p1 = por %p455_p13, %p454_p10 }
  0x47   : > { %p457_p3 = pnand %p456_p1, %p450_p0 }
  0xbc   : > { %v188_v4 = vpop.permute.xlu0 %187 }
  0xbd   : > { %v190_v5 = vmul.f32 %v188_v4, %v182_v2  ;;  %v191_v6 = vmul.f32 %v188_v4, %v183_v3 }
  0xbf   : > { %v193_v7 = vsel %vm192_vm0, %v190_v5, 0.0  ;;  %v200_v8 = vsel %vm192_vm0, %v191_v6, 0.0 }
  0xc0   : > { %v194_v9 = vrot.slane %v193_v7, 4  ;;  %v201_v10 = vrot.slane %v200_v8, 4 }
  0xc2   : > { %v195_v11 = vadd.f32 %v194_v9, %v193_v7  ;;  %v202_v12 = vadd.f32 %v201_v10, %v200_v8 }
  0xc4   : > { %v196_v13 = vrot.slane %v195_v11, 2  ;;  %v203_v14 = vrot.slane %v202_v12, 2 }
  0xc6   : > { %v197_v15 = vadd.f32 %v196_v13, %v195_v11  ;;  %v204_v16 = vadd.f32 %v203_v14, %v202_v12 }
  0xc8   : > { %v198_v17 = vrot.slane %v197_v15, 1  ;;  %v205_v18 = vrot.slane %v204_v16, 1 }
  0xca   : > { %v199_v19 = vadd.f32 %v198_v17, %v197_v15  ;;  %v206_v20 = vadd.f32 %v205_v18, %v204_v16 }
  0xcc   : > { %v333_v21 = vmul.f32 -1.442695, %v199_v19  ;;  %v334_v22 = vmul.f32 -1.442695, %v206_v20 }
  0xce   : > { %409 = vpow2.f32 %v333_v21 }
  0xcf   : > { %411 = vpow2.f32 %v334_v22 }
  0xd8   : > { %v410_v23 = vpop.eup %409 }
  0xd9   : > { %v412_v24 = vpop.eup %411  ;;  %v213_v25 = vadd.f32 1.0, %v410_v23 }
  0xda   : > { %v214_v26 = vadd.f32 1.0, %v412_v24 }
  0xdb   : > { %413 = vrcp.f32 %v213_v25 }
  0xdc   : > { %415 = vrcp.f32 %v214_v26 }
  0xe5   : > { %v414_v27 = vpop.eup %413 }
  0xe6   : > { %v416_v28 = vpop.eup %415  ;;  %v219_v29 = vmul.f32 %v414_v27, %v182_v2 }
  0xe7   : > { %v220_v30 = vmul.f32 %v416_v28, %v183_v3 }
  0xe8   : > { %221 = vst [vmem:[%s179_s21] sm:$0xf] %v219_v29 }
  0xe9   : > { %222 = vst [vmem:[%s179_s21 + $0x4] sm:$0xf] %v220_v30 }
  0xea   : > { %460 = shalt.err (!%p457_p3)
}
  0xeb   : > { %s461_s29 = scalar_lea.hbm %s686_s20, 128  ;;  %s465_s15 = scalar_lea.hbm %s737_s2, 256 }
  0xec   : > { %p462_p4 = scmp.ne.s32.totalorder %s686_s20, %s461_s29  ;;  %p466_p12 = scmp.lt.u32.totalorder %s686_s20, %s737_s2 }
  0xed   : > { %p467_p2 = scmp.lt.u32.totalorder %s465_s15, %s461_s29  ;;  %p469_p8 = scmp.lt.u32.totalorder %s461_s29, %s686_s20 }
  0xee   : > { %p463_p6 = pnand %p462_p4, %p744_p9 }
  0xef   : > { %p468_p5 = por %p467_p2, %p466_p12 }
  0xf0   : > { %p464_p7 = pneg %p463_p6 }
  0xf1   : > { %p470_p11 = por %p469_p8, %p468_p5 }
  0xf3   : > { %p471_p0 = pnand %p470_p11, %p464_p7 }
  0xf5   : > { %474 = shalt.err (!%p471_p0)
}
  0xf6   : > { %s537_s4 = smov 64   ;;  %s538_s21 = smov 128  }
  0xf7   : > { %s539_s6 = smov 4  }
  0xf8   : > { %341 = dma.vmem_to_hbm [thread:$0]  (%p744_p9), %s681_s5, 128, %s686_s20, %s224_s25, %s537_s4, %s538_s21, %s539_s6  }
  0xf9 PF: > { %s254_s18 = sand.u32 1, %s509_s9   ;;  %p745_p10 = scmp.ne.s32.totalorder %s742_s24, 0 }
  0xfa   : > { %p746_p13 = scmp.ge.s32.totalorder %s529_s14, 2  ;;  %s255_s19 = scalar_lea.sflag [#allocation4], %s254_s18 }
  0xfc   : > { %p348_p1 = pnand %p746_p13, %p745_p10 }
  0xfe   : > { %504 = dma.done.wait (!%p348_p1), %s255_s19, 128  }
  0xff   : > { %506 = vsyncadd (!%p348_p1), %s255_s19, 4294967168  ;;  %s18_s14 = sadd.s32 1, %s529_s14   ;;  %s747_s9 = smov %s513_s10 }
 0x100   : > { %p15_p3 = scmp.ge.s32.totalorder %s18_s14, 4   ;;  %s748_s10 = smov %s517_s11 }
 0x101   : > { %s749_s11 = smov %s611_s23  ;;  %s750_s12 = smov %s525_s13 }
 0x102   : > { %s751_s13 = smov %s753_s17  ;;  %17 = sbr.rel (!%p15_p3) target bundleno = 6 (0x6), region = 73 }
 0x109   :  { %260 = vsyncpa [#allocation3], 1 }
 0x10a   :  { %262 = vsyncpa [#allocation3 + $0x1], 1 }
 0x10b   :  { %263 = vsyncpa [#allocation4], 1 }
 0x10c   :  { %265 = vsyncpa [#allocation4 + $0x1], 1 }

</bundles_post_ra>
